<compile_context>
chip_gen: v5e
topology: v5e:2x2
jax: 0.10.0
libtpu: 0.0.40
codegen_flags: <defaults>
</compile_context>

<pallas_src>
import functools

import jax
import jax.numpy as jnp
from jax import lax
from jax.experimental import pallas as pl
from jax.experimental.pallas import tpu as pltpu


def _round_up(v, m):
    return ((v + m - 1) // m) * m


def dense_kernel(x_ref, w_ref, b_ref, *rest, apply_dropout):
    if apply_dropout:
        mask_ref, o_ref, acc_ref = rest
    else:
        o_ref, acc_ref = rest
        mask_ref = None

    k = pl.program_id(2)

    @pl.when(k == 0)
    def _():
        acc_ref[...] = jnp.zeros_like(acc_ref)

    # x tile: [tm, tk]; w tile: [tn, tk] (native nn.Linear layout).
    # Contract the shared K axis on the MXU -> [tm, tn], f32 accumulate.
    acc_ref[...] += lax.dot_general(
        x_ref[...],
        w_ref[...],
        dimension_numbers=(((1,), (1,)), ((), ())),
        preferred_element_type=jnp.float32,
    )

    @pl.when(k == pl.num_programs(2) - 1)
    def _():
        y = acc_ref[...] + b_ref[...]
        if apply_dropout:
            y = y * mask_ref[...]          # 0 or 1/(1-p): inverted dropout
        y = jnp.maximum(y, 0.0)            # ReLU
        o_ref[...] = y.astype(o_ref.dtype)


def dense_forward(x, weight, bias, *, dropout=True, dropout_p=0.5, key=None,
                  tile_m=128, tile_n=512, tile_k=1024, compute_dtype=None):
    """VGG16 Dense forward: relu(dropout(x @ weight.T + bias)).

    x: [B, Cin] ; weight: [Cout, Cin] (PyTorch nn.Linear layout) ; bias: [Cout].
    compute_dtype: optionally cast x/weight (e.g. jnp.bfloat16) to halve the
    dominant weight-stream HBM traffic; accumulation stays float32.
    """
    B, Cin = x.shape
    Cout, Cin_w = weight.shape
    assert Cin == Cin_w and bias.shape == (Cout,)
    out_dtype = x.dtype

    if compute_dtype is not None:
        x = x.astype(compute_dtype)
        weight = weight.astype(compute_dtype)

    # ---- pad to TPU-friendly shapes (sublane mult of 8, lane mult of 128) ----
    tm = min(_round_up(B, 8), tile_m)
    Mp = _round_up(B, tm)
    tn = min(_round_up(Cout, 128), tile_n)
    Np = _round_up(_round_up(Cout, 128), tn)
    tk = min(_round_up(Cin, 128), tile_k)
    Kp = _round_up(_round_up(Cin, 128), tk)

    x_p = jnp.pad(x, ((0, Mp - B), (0, Kp - Cin)))
    w_p = jnp.pad(weight, ((0, Np - Cout), (0, Kp - Cin)))
    b_p = jnp.pad(bias, (0, Np - Cout)).reshape(1, Np).astype(jnp.float32)

    grid = (Mp // tm, Np // tn, Kp // tk)

    in_specs = [
        pl.BlockSpec((tm, tk), lambda i, j, k: (i, k)),   # x (tiny, stays hot)
        pl.BlockSpec((tn, tk), lambda i, j, k: (j, k)),   # weight stream
        pl.BlockSpec((1, tn), lambda i, j, k: (0, j)),    # bias
    ]
    args = [x_p, w_p, b_p]

    if dropout:
        if key is None:
            key = jax.random.PRNGKey(0)
        keep = jax.random.bernoulli(key, 1.0 - dropout_p, (B, Cout))
        mask = keep.astype(jnp.float32) / (1.0 - dropout_p)
        mask_p = jnp.pad(mask, ((0, Mp - B), (0, Np - Cout)))
        in_specs.append(pl.BlockSpec((tm, tn), lambda i, j, k: (i, j)))
        args.append(mask_p)

    kernel = functools.partial(dense_kernel, apply_dropout=dropout)

    cost = pl.CostEstimate(
        flops=2 * B * Cin * Cout,
        transcendentals=0,
        bytes_accessed=(x_p.size * x_p.dtype.itemsize
                        + w_p.size * w_p.dtype.itemsize
                        + Mp * Np * jnp.dtype(out_dtype).itemsize),
    )

    out_p = pl.pallas_call(
        kernel,
        out_shape=jax.ShapeDtypeStruct((Mp, Np), out_dtype),
        grid=grid,
        in_specs=in_specs,
        out_specs=pl.BlockSpec((tm, tn), lambda i, j, k: (i, j)),
        scratch_shapes=[pltpu.VMEM((tm, tn), jnp.float32)],
        compiler_params=pltpu.CompilerParams(
            dimension_semantics=("parallel", "parallel", "arbitrary"),
            vmem_limit_bytes=48 * 1024 * 1024,
        ),
        cost_estimate=cost,
    )(*args)

    return out_p[:B, :Cout]


if __name__ == "__main__":
    key = jax.random.PRNGKey(0)
    kx, kw, kb, kdo = jax.random.split(key, 4)

    B, C_IN, C_OUT = 8, 32, 64

    x = jax.random.normal(kx, (B, C_IN), dtype=jnp.float32)
    # PyTorch nn.Linear default init: U(-1/sqrt(fan_in), 1/sqrt(fan_in))
    bound = 1.0 / jnp.sqrt(C_IN)
    weight = jax.random.uniform(kw, (C_OUT, C_IN), jnp.float32, -bound, bound)
    bias = jax.random.uniform(kb, (C_OUT,), jnp.float32, -bound, bound)

    # Eval path (dropout disabled): exact check against pure-JAX reference.
    out_eval = dense_forward(x, weight, bias, dropout=False)
    jax.block_until_ready(out_eval)
    ref_eval = jnp.maximum(x @ weight.T + bias, 0.0)
    assert out_eval.shape == (B, C_OUT)
    assert jnp.allclose(out_eval, ref_eval, atol=1e-5, rtol=1e-5), "eval mismatch"

    # Train path (dropout p=0.5, inverted scaling): same host-side mask
    # regenerated here, so the check is exact.
    out_train = dense_forward(x, weight, bias, dropout=True, key=kdo)
    jax.block_until_ready(out_train)
    keep = jax.random.bernoulli(kdo, 0.5, (B, C_OUT)).astype(jnp.float32)
    ref_train = jnp.maximum((x @ weight.T + bias) * keep * 2.0, 0.0)
    assert out_train.shape == (B, C_OUT)
    assert jnp.allclose(out_train, ref_train, atol=1e-5, rtol=1e-5), "train mismatch"

    print("KERNEL_OK")
</pallas_src>

<mosaic_0001>
module attributes {stable_mosaic.version = 11 : i64} {
  func.func @dense_kernel(%arg0: i32, %arg1: i32, %arg2: i32, %arg3: memref<8x128xf32, #tpu.memory_space<vmem>>, %arg4: memref<128x128xf32, #tpu.memory_space<vmem>>, %arg5: memref<1x128xf32, #tpu.memory_space<vmem>>, %arg6: memref<8x128xf32, #tpu.memory_space<vmem>>, %arg7: memref<8x128xf32, #tpu.memory_space<vmem>>) attributes {dimension_semantics = [#tpu.dimension_semantics<parallel>, #tpu.dimension_semantics<parallel>, #tpu.dimension_semantics<arbitrary>], iteration_bounds = array<i64: 1, 1, 1>, scalar_prefetch = 0 : i64, scratch_operands = 1 : i64, tpu.core_type = #tpu.core_type<tc>, window_params = [{transform_indices = @transform_0, window_bounds = array<i64: 8, 128>}, {transform_indices = @transform_1, window_bounds = array<i64: 128, 128>}, {transform_indices = @transform_2, window_bounds = array<i64: 1, 128>}, {transform_indices = @transform_3, window_bounds = array<i64: 8, 128>}]} {
    %c0_i32 = arith.constant 0 : i32
    %0 = arith.cmpi eq, %arg2, %c0_i32 : i32
    %1 = arith.extui %0 : i1 to i32
    %c0_i32_0 = arith.constant 0 : i32
    %2 = arith.cmpi ne, %1, %c0_i32_0 : i32
    scf.if %2 {
      %cst_10 = arith.constant 0.000000e+00 : f32
      %12 = vector.broadcast %cst_10 : f32 to vector<8x128xf32>
      %c0_11 = arith.constant 0 : index
      %c0_12 = arith.constant 0 : index
      %13 = vector.load %arg7[%c0_11, %c0_12] : memref<8x128xf32, #tpu.memory_space<vmem>>, vector<8x128xf32>
      tpu.vector_store %arg7[%c0_11, %c0_12], %12 {strides = array<i32>} : memref<8x128xf32, #tpu.memory_space<vmem>>, vector<8x128xf32>,
    } else {
    }
    %c0 = arith.constant 0 : index
    %c0_1 = arith.constant 0 : index
    %3 = vector.load %arg7[%c0, %c0_1] : memref<8x128xf32, #tpu.memory_space<vmem>>, vector<8x128xf32>
    %c0_2 = arith.constant 0 : index
    %c0_3 = arith.constant 0 : index
    %4 = vector.load %arg3[%c0_2, %c0_3] : memref<8x128xf32, #tpu.memory_space<vmem>>, vector<8x128xf32>
    %c0_4 = arith.constant 0 : index
    %c0_5 = arith.constant 0 : index
    %5 = vector.load %arg4[%c0_4, %c0_5] : memref<128x128xf32, #tpu.memory_space<vmem>>, vector<128x128xf32>
    %cst = arith.constant dense<0.000000e+00> : vector<8x128xf32>
    %6 = tpu.matmul %4, %5, %cst {dimension_numbers = #tpu.dot_dimension_numbers<[1], [1], [0], [0], [0, 0, 1, 0], [], []>} : vector<8x128xf32>, vector<128x128xf32>, vector<8x128xf32> -> vector<8x128xf32>
    %7 = arith.addf %3, %6 : vector<8x128xf32>
    %c0_6 = arith.constant 0 : index
    %c0_7 = arith.constant 0 : index
    %8 = vector.load %arg7[%c0_6, %c0_7] : memref<8x128xf32, #tpu.memory_space<vmem>>, vector<8x128xf32>
    tpu.vector_store %arg7[%c0_6, %c0_7], %7 {strides = array<i32>} : memref<8x128xf32, #tpu.memory_space<vmem>>, vector<8x128xf32>,
    %c0_i32_8 = arith.constant 0 : i32
    %9 = arith.cmpi eq, %arg2, %c0_i32_8 : i32
    %10 = arith.extui %9 : i1 to i32
    %c0_i32_9 = arith.constant 0 : i32
    %11 = arith.cmpi ne, %10, %c0_i32_9 : i32
    scf.if %11 {
      %c0_10 = arith.constant 0 : index
      %c0_11 = arith.constant 0 : index
      %12 = vector.load %arg7[%c0_10, %c0_11] : memref<8x128xf32, #tpu.memory_space<vmem>>, vector<8x128xf32>
      %c0_12 = arith.constant 0 : index
      %c0_13 = arith.constant 0 : index
      %13 = vector.load %arg5[%c0_12, %c0_13] : memref<1x128xf32, #tpu.memory_space<vmem>>, vector<1x128xf32>
      %14 = vector.broadcast %13 : vector<1x128xf32> to vector<8x128xf32>
      %15 = arith.addf %12, %14 : vector<8x128xf32>
      %cst_14 = arith.constant 0.000000e+00 : f32
      %16 = vector.broadcast %cst_14 : f32 to vector<8x128xf32>
      %17 = arith.maximumf %15, %16 : vector<8x128xf32>
      %c0_15 = arith.constant 0 : index
      %c0_16 = arith.constant 0 : index
      %18 = vector.load %arg6[%c0_15, %c0_16] : memref<8x128xf32, #tpu.memory_space<vmem>>, vector<8x128xf32>
      tpu.vector_store %arg6[%c0_15, %c0_16], %17 {strides = array<i32>} : memref<8x128xf32, #tpu.memory_space<vmem>>, vector<8x128xf32>,
    } else {
    }
    return
  }
  func.func @transform_0(%arg0: i32, %arg1: i32, %arg2: i32) -> (i32, i32) {
    %c0_i32 = arith.constant 0 : i32
    return %arg0, %arg2 : i32, i32
  }
  func.func @transform_1(%arg0: i32, %arg1: i32, %arg2: i32) -> (i32, i32) {
    %c0_i32 = arith.constant 0 : i32
    return %arg1, %arg2 : i32, i32
  }
  func.func @transform_2(%arg0: i32, %arg1: i32, %arg2: i32) -> (i32, i32) {
    %c0_i32 = arith.constant 0 : i32
    %c0_i32_0 = arith.constant 0 : i32
    return %c0_i32, %arg1 : i32, i32
  }
  func.func @transform_3(%arg0: i32, %arg1: i32, %arg2: i32) -> (i32, i32) {
    %c0_i32 = arith.constant 0 : i32
    return %arg0, %arg1 : i32, i32
  }
}

</mosaic_0001>

<bundles_post_ra>
// kernel: tpu_custom_call.1
= control target key start
LH: loop header
LB: loop body
LE: loop exit
PB: predicated region body
PF: predicated region fallthrough
CT: control target
= control target key end

     0   :  { %8 = vsyncpa [#allocation4], 0  ;;  %s240_s0 = inlined_call_operand.hbm [shape: f32[8,128], index: 0, kind: input, shape index: {}]   ;;  %s241_s1 = inlined_call_operand.hbm [shape: f32[128,128], index: 1, kind: input, shape index: {}]   ;;  %s242_s2 = inlined_call_operand.vmem [shape: f32[1,128], index: 2, kind: input, shape index: {}]   ;;  %s243_s3 = inlined_call_operand.hbm [shape: f32[8,128], index: 3, kind: output, shape index: {}]  }
   0x1   :  { %9 = vsyncpa [#allocation7], 0 }
   0x2   :  { %10 = vsyncpa [#allocation5], 0  ;;  %s16_s14 = sshll.u32 %s240_s0, 4  ;;  %s203_s15 = smov [#allocation3]   ;;  %s17_s14 = int_to_ptr.hbm [resolvable:$true] %s16_s14 }
   0x3   :  { %s18_s16 = sshll.u32 %s203_s15, 4  ;;  %s26_s19 = sshll.u32 %s241_s1, 4  ;;  %s19_s16 = int_to_ptr.vmem [resolvable:$true] %s18_s16  ;;  %s27_s19 = int_to_ptr.hbm [resolvable:$true] %s26_s19 }
   0x4   :  { %21 = dma.hbm_to_vmem [thread:$0]  %s17_s14, 128, %s19_s16, [#allocation4]  }
   0x5   :  { %s204_s20 = smov [#allocation6]   ;;  %s205_s22 = smov 128  }
   0x6   :  { %s28_s21 = sshll.u32 %s204_s20, 4  ;;  %s206_s23 = smov 8   ;;  %s29_s21 = int_to_ptr.vmem [resolvable:$true] %s28_s21 }
   0x7   :  { %34 = dma.hbm_to_vmem [thread:$0]  %s27_s19, 2048, %s29_s21, [#allocation7], %s205_s22, %s205_s22, %s206_s23  }
   0x8   :  { %197 = dma.done.wait [#allocation4], 128  }
   0x9   :  { %198 = vsyncadd [#allocation4], 4294967168 }
   0xa   :  { %199 = dma.done.wait [#allocation7], 2048  }
   0xb   :  { %200 = vsyncadd [#allocation7], 4294965248  ;;  %v67_v0 = vld [vmem:[#allocation6 + $0x78] sm:$0xff]  ;;  %v66_v1 = vld [vmem:[#allocation6 + $0x70] sm:$0xff]  ;;  %s207_s24 = smov [#allocation8]   ;;  %s108_s28 = sshll.u32 %s243_s3, 4  ;;  %s109_s28 = int_to_ptr.hbm [resolvable:$true] %s108_s28 }
   0xc   :  { %68 = vmatpush.xpose.msra.mxu0 %v67_v0  ;;  %v65_v2 = vld [vmem:[#allocation6 + $0x68] sm:$0xff]  ;;  %v64_v3 = vld [vmem:[#allocation6 + $0x60] sm:$0xff]  ;;  %v63_v4 = vld [vmem:[#allocation6 + $0x58] sm:$0xff]  ;;  %s106_s25 = sshll.u32 %s207_s24, 4  ;;  %s107_s25 = int_to_ptr.vmem [resolvable:$true] %s106_s25 }
   0xd   :  { %v62_v5 = vld [vmem:[#allocation6 + $0x50] sm:$0xff]  ;;  %v61_v6 = vld [vmem:[#allocation6 + $0x48] sm:$0xff]  ;;  %v60_v7 = vld [vmem:[#allocation6 + $0x40] sm:$0xff] }
   0xe   :  { %v59_v8 = vld [vmem:[#allocation6 + $0x38] sm:$0xff]  ;;  %v58_v9 = vld [vmem:[#allocation6 + $0x30] sm:$0xff]  ;;  %v57_v10 = vld [vmem:[#allocation6 + $0x28] sm:$0xff] }
   0xf   :  { %v56_v11 = vld [vmem:[#allocation6 + $0x20] sm:$0xff]  ;;  %v55_v12 = vld [vmem:[#allocation6 + $0x18] sm:$0xff]  ;;  %v54_v13 = vld [vmem:[#allocation6 + $0x10] sm:$0xff] }
  0x10   :  { %69 = vmatpush.xpose.msra.mxu0 %v66_v1  ;;  %v53_v14 = vld [vmem:[#allocation6 + $0x8] sm:$0xff]  ;;  %v52_v15 = vld [vmem:[#allocation6] sm:$0xff]  ;;  %v51_v16 = vld [vmem:[#allocation3] sm:$0xff] }
  0x11   :  { %v124_v17 = vld [vmem:[%s242_s2] ss:$0 sm:$0xff] }
  0x14   :  { %70 = vmatpush.xpose.msra.mxu0 %v65_v2 }
  0x18   :  { %71 = vmatpush.xpose.msra.mxu0 %v64_v3 }
  0x1c   :  { %72 = vmatpush.xpose.msra.mxu0 %v63_v4 }
  0x20   :  { %73 = vmatpush.xpose.msra.mxu0 %v62_v5 }
  0x24   :  { %74 = vmatpush.xpose.msra.mxu0 %v61_v6 }
  0x28   :  { %75 = vmatpush.xpose.msra.mxu0 %v60_v7 }
  0x2c   :  { %76 = vmatpush.xpose.msra.mxu0 %v59_v8 }
  0x30   :  { %77 = vmatpush.xpose.msra.mxu0 %v58_v9 }
  0x34   :  { %78 = vmatpush.xpose.msra.mxu0 %v57_v10 }
  0x38   :  { %79 = vmatpush.xpose.msra.mxu0 %v56_v11 }
  0x3c   :  { %80 = vmatpush.xpose.msra.mxu0 %v55_v12 }
  0x40   :  { %81 = vmatpush.xpose.msra.mxu0 %v54_v13 }
  0x44   :  { %82 = vmatpush.xpose.msra.mxu0 %v53_v14 }
  0x48   :  { %83 = vmatpush.xpose.msra.mxu0 %v52_v15 }
  0x4b   :  { %84 = vmatmul.f32.vlgmr.msra.gmra.mxu0 %v51_v16 }
  0xc8   :  { %v85_v18 = vpop.f32.mrf.mxu0 }
  0xc9   :  { %v98_v19 = vadd.f32 %v124_v17, %v85_v18 }
  0xcb   :  { %v99_v20 = vmax.f32 %v98_v19, 0.0 }
  0xcd   :  { %100 = vst [vmem:[#allocation8] sm:$0xff] %v99_v20 }
  0xce   :  { %111 = dma.vmem_to_hbm [thread:$0]  %s107_s25, 128, %s109_s28, [#allocation5]  }
  0xcf   :  { %201 = dma.done.wait [#allocation5], 128  }
  0xd0   :  { %202 = vsyncadd [#allocation5], 4294967168 }
  0xd1   :  { %116 = vsyncpa [#allocation4], 1 }
  0xd2   :  { %117 = vsyncpa [#allocation7], 1 }
  0xd3   :  { %118 = vsyncpa [#allocation5], 1 }

</bundles_post_ra>
